<compile_context>
chip_gen: v5e
topology: v5e:2x2
jax: 0.10.0
libtpu: 0.0.40
codegen_flags: <defaults>
</compile_context>

<pallas_src>
import functools

import jax
import jax.numpy as jnp
from jax.experimental import pallas as pl
from jax.experimental.pallas import tpu as pltpu


def _round_up(x, m):
    return ((x + m - 1) // m) * m


def actor_kernel(x_ref, w1_ref, b1_ref, w2_ref, b2_ref, w3_ref, b3_ref, out_ref):
    # x_ref: (state_dim, TB); w*: (out, in); b*: (out, 1); out_ref: (n_actions, TB).
    x = x_ref[...]

    # Layer 1: Linear(state_dim, 64) + Tanh        -> (64, TB)
    h1 = jnp.tanh(
        jnp.dot(w1_ref[...], x, preferred_element_type=jnp.float32) + b1_ref[...])
    # Layer 2: Linear(64, 32) + Tanh                -> (32, TB)
    h2 = jnp.tanh(
        jnp.dot(w2_ref[...], h1, preferred_element_type=jnp.float32) + b2_ref[...])
    # Layer 3: Linear(32, n_actions)                -> (n_actions, TB)
    logits = jnp.dot(w3_ref[...], h2, preferred_element_type=jnp.float32) + b3_ref[...]

    # Softmax over the action (sublane) axis, independently per batch column.
    m = jnp.max(logits, axis=0, keepdims=True)
    e = jnp.exp(logits - m)
    denom = jnp.sum(e, axis=0, keepdims=True)
    out_ref[...] = (e / denom).astype(out_ref.dtype)   # exact normalization


def _choose_tile(B, cap):
    # Batch tile: multiple of 256 (fills the 256-wide MXU N dim on v6e/v7x,
    # also a multiple of 128 for v5e / the vreg lane width). Aim for >=2 grid
    # steps when the batch allows, so megacore sharding has work for both TCs.
    cand = _round_up(max(1, (B + 1) // 2), 256)
    cap = max(256, _round_up(cap, 256))
    return min(cand, cap)


@functools.partial(jax.jit, static_argnames=("tb",))
def actor_forward(x, params, *, tb=2048):
    """x: (B, state_dim) float32 -> (B, n_actions) softmax probabilities."""
    w1, b1, w2, b2, w3, b3 = (params["w1"], params["b1"], params["w2"],
                              params["b2"], params["w3"], params["b3"])
    B, state_dim = x.shape
    h1_dim, h2_dim = w1.shape[0], w2.shape[0]
    n_actions = w3.shape[0]

    xt = x.T                                    # (state_dim, B): batch-in-lane
    TB = _choose_tile(B, tb)
    grid = (pl.cdiv(B, TB),)                    # ragged last block handled by Pallas

    def resident(a):                            # weights/biases stay in VMEM
        return pl.BlockSpec(a.shape, lambda i: (0, 0))

    flops = 2 * B * (state_dim * h1_dim + h1_dim * h2_dim + h2_dim * n_actions)
    transcendentals = B * (h1_dim + h2_dim + n_actions)          # tanh + exp
    bytes_accessed = (
        B * state_dim * 4                                        # x (f32)
        + B * n_actions * 4                                      # out (f32)
        + (state_dim * h1_dim + h1_dim * h2_dim + h2_dim * n_actions) * 4
        + (h1_dim + h2_dim + n_actions) * 4)

    out_t = pl.pallas_call(
        actor_kernel,
        out_shape=jax.ShapeDtypeStruct((n_actions, B), jnp.float32),
        grid=grid,
        in_specs=[
            pl.BlockSpec((state_dim, TB), lambda i: (0, i)),
            resident(w1), resident(b1),
            resident(w2), resident(b2),
            resident(w3), resident(b3),
        ],
        out_specs=pl.BlockSpec((n_actions, TB), lambda i: (0, i)),
        compiler_params=pltpu.CompilerParams(
            dimension_semantics=("parallel",),
        ),
        cost_estimate=pl.CostEstimate(
            flops=flops,
            transcendentals=transcendentals,
            bytes_accessed=bytes_accessed,
        ),
    )(xt, w1, b1, w2, b2, w3, b3)

    return out_t.T                              # (B, n_actions)


def init_params(key, state_dim, n_actions):
    """Deterministic init mirroring the PyTorch Actor layer shapes.
    Weights are PyTorch-native (out_features, in_features); biases (out, 1).
    (Synthetic init -- not a checkpoint load.)"""
    ks = jax.random.split(key, 6)

    def linear(kw, kb, fan_in, fan_out):
        # PyTorch default Linear init: U(-1/sqrt(fan_in), 1/sqrt(fan_in))
        bound = 1.0 / jnp.sqrt(jnp.float32(fan_in))
        w = jax.random.uniform(kw, (fan_out, fan_in), jnp.float32, -bound, bound)
        b = jax.random.uniform(kb, (fan_out, 1), jnp.float32, -bound, bound)
        return w, b

    w1, b1 = linear(ks[0], ks[1], state_dim, 64)
    w2, b2 = linear(ks[2], ks[3], 64, 32)
    w3, b3 = linear(ks[4], ks[5], 32, n_actions)
    return {"w1": w1, "b1": b1, "w2": w2, "b2": b2, "w3": w3, "b3": b3}


def actor_reference(x, p):
    """Pure-JAX f32 reference matching the PyTorch forward."""
    h1 = jnp.tanh(x @ p["w1"].T + p["b1"][:, 0])
    h2 = jnp.tanh(h1 @ p["w2"].T + p["b2"][:, 0])
    logits = h2 @ p["w3"].T + p["b3"][:, 0]
    return jax.nn.softmax(logits, axis=-1)


if __name__ == "__main__":
    state_dim, n_actions = 8, 4

    key = jax.random.PRNGKey(0)
    k_p, k_x1, k_x2 = jax.random.split(key, 3)
    params = init_params(k_p, state_dim, n_actions)

    # Case 1: tiny batch (single ragged grid block; exercises masked tail columns).
    x1 = jax.random.normal(k_x1, (6, state_dim), jnp.float32)
    out1 = jax.block_until_ready(actor_forward(x1, params))
    assert out1.shape == (6, n_actions)
    assert jnp.allclose(out1, actor_reference(x1, params), atol=5e-3, rtol=5e-3), \
        "mismatch vs f32 reference (small batch)"
    assert jnp.allclose(jnp.sum(out1, axis=-1), 1.0, atol=1e-3), \
        "softmax rows must sum to 1 (small batch)"

    # Case 2: batch spanning 2 grid steps (TB=512) with a ragged last block.
    x2 = jax.random.normal(k_x2, (520, state_dim), jnp.float32)
    out2 = jax.block_until_ready(actor_forward(x2, params))
    assert out2.shape == (520, n_actions)
    assert jnp.allclose(out2, actor_reference(x2, params), atol=5e-3, rtol=5e-3), \
        "mismatch vs f32 reference (tiled path)"
    assert jnp.allclose(jnp.sum(out2, axis=-1), 1.0, atol=1e-3), \
        "softmax rows must sum to 1 (tiled path)"

    print("KERNEL_OK")
</pallas_src>

<mosaic_0001>
module attributes {stable_mosaic.version = 11 : i64} {
  func.func @actor_kernel(%arg0: i32, %arg1: memref<8x256xf32, #tpu.memory_space<vmem>>, %arg2: memref<64x8xf32, #tpu.memory_space<vmem>>, %arg3: memref<64x1xf32, #tpu.memory_space<vmem>>, %arg4: memref<32x64xf32, #tpu.memory_space<vmem>>, %arg5: memref<32x1xf32, #tpu.memory_space<vmem>>, %arg6: memref<4x32xf32, #tpu.memory_space<vmem>>, %arg7: memref<4x1xf32, #tpu.memory_space<vmem>>, %arg8: memref<4x256xf32, #tpu.memory_space<vmem>>) attributes {dimension_semantics = [#tpu.dimension_semantics<parallel>], iteration_bounds = array<i64: 1>, scalar_prefetch = 0 : i64, scratch_operands = 0 : i64, tpu.core_type = #tpu.core_type<tc>, window_params = [{transform_indices = @transform_0, window_bounds = array<i64: 8, 256>}, {pipeline_mode = #tpu.pipeline_mode<synchronous>, transform_indices = @transform_1, window_bounds = array<i64: 64, 8>}, {pipeline_mode = #tpu.pipeline_mode<synchronous>, transform_indices = @transform_2, window_bounds = array<i64: 64, 1>}, {pipeline_mode = #tpu.pipeline_mode<synchronous>, transform_indices = @transform_3, window_bounds = array<i64: 32, 64>}, {pipeline_mode = #tpu.pipeline_mode<synchronous>, transform_indices = @transform_4, window_bounds = array<i64: 32, 1>}, {pipeline_mode = #tpu.pipeline_mode<synchronous>, transform_indices = @transform_5, window_bounds = array<i64: 4, 32>}, {pipeline_mode = #tpu.pipeline_mode<synchronous>, transform_indices = @transform_6, window_bounds = array<i64: 4, 1>}, {transform_indices = @transform_7, window_bounds = array<i64: 4, 256>}]} {
    %c0 = arith.constant 0 : index
    %c0_0 = arith.constant 0 : index
    %0 = vector.load %arg1[%c0, %c0_0] : memref<8x256xf32, #tpu.memory_space<vmem>>, vector<8x256xf32>
    %c0_1 = arith.constant 0 : index
    %c0_2 = arith.constant 0 : index
    %1 = vector.load %arg2[%c0_1, %c0_2] : memref<64x8xf32, #tpu.memory_space<vmem>>, vector<64x8xf32>
    %cst = arith.constant dense<0.000000e+00> : vector<64x256xf32>
    %2 = tpu.matmul %1, %0, %cst {dimension_numbers = #tpu.dot_dimension_numbers<[1], [0], [0], [1], [0, 0, 1, 1], [], []>} : vector<64x8xf32>, vector<8x256xf32>, vector<64x256xf32> -> vector<64x256xf32>
    %c0_3 = arith.constant 0 : index
    %c0_4 = arith.constant 0 : index
    %3 = vector.load %arg3[%c0_3, %c0_4] : memref<64x1xf32, #tpu.memory_space<vmem>>, vector<64x1xf32>
    %4 = vector.broadcast %3 : vector<64x1xf32> to vector<64x256xf32>
    %5 = arith.addf %2, %4 : vector<64x256xf32>
    %6 = math.tanh %5 : vector<64x256xf32>
    %c0_5 = arith.constant 0 : index
    %c0_6 = arith.constant 0 : index
    %7 = vector.load %arg4[%c0_5, %c0_6] : memref<32x64xf32, #tpu.memory_space<vmem>>, vector<32x64xf32>
    %cst_7 = arith.constant dense<0.000000e+00> : vector<32x256xf32>
    %8 = tpu.matmul %7, %6, %cst_7 {dimension_numbers = #tpu.dot_dimension_numbers<[1], [0], [0], [1], [0, 0, 1, 1], [], []>} : vector<32x64xf32>, vector<64x256xf32>, vector<32x256xf32> -> vector<32x256xf32>
    %c0_8 = arith.constant 0 : index
    %c0_9 = arith.constant 0 : index
    %9 = vector.load %arg5[%c0_8, %c0_9] : memref<32x1xf32, #tpu.memory_space<vmem>>, vector<32x1xf32>
    %10 = vector.broadcast %9 : vector<32x1xf32> to vector<32x256xf32>
    %11 = arith.addf %8, %10 : vector<32x256xf32>
    %12 = math.tanh %11 : vector<32x256xf32>
    %c0_10 = arith.constant 0 : index
    %c0_11 = arith.constant 0 : index
    %13 = vector.load %arg6[%c0_10, %c0_11] : memref<4x32xf32, #tpu.memory_space<vmem>>, vector<4x32xf32>
    %cst_12 = arith.constant dense<0.000000e+00> : vector<4x256xf32>
    %14 = tpu.matmul %13, %12, %cst_12 {dimension_numbers = #tpu.dot_dimension_numbers<[1], [0], [0], [1], [0, 0, 1, 1], [], []>} : vector<4x32xf32>, vector<32x256xf32>, vector<4x256xf32> -> vector<4x256xf32>
    %c0_13 = arith.constant 0 : index
    %c0_14 = arith.constant 0 : index
    %15 = vector.load %arg7[%c0_13, %c0_14] : memref<4x1xf32, #tpu.memory_space<vmem>>, vector<4x1xf32>
    %16 = vector.broadcast %15 : vector<4x1xf32> to vector<4x256xf32>
    %17 = arith.addf %14, %16 : vector<4x256xf32>
    %cst_15 = arith.constant dense<0xFF800000> : vector<256xf32>
    %18 = vector.multi_reduction <maximumf>, %17, %cst_15 [0] : vector<4x256xf32> to vector<256xf32>
    %19 = vector.shape_cast %18 : vector<256xf32> to vector<1x256xf32>
    %20 = vector.broadcast %19 : vector<1x256xf32> to vector<4x256xf32>
    %21 = arith.subf %17, %20 : vector<4x256xf32>
    %22 = math.exp %21 : vector<4x256xf32>
    %cst_16 = arith.constant dense<0.000000e+00> : vector<256xf32>
    %23 = vector.multi_reduction <add>, %22, %cst_16 [0] : vector<4x256xf32> to vector<256xf32>
    %24 = vector.shape_cast %23 : vector<256xf32> to vector<1x256xf32>
    %25 = vector.broadcast %24 : vector<1x256xf32> to vector<4x256xf32>
    %26 = arith.divf %22, %25 : vector<4x256xf32>
    %c0_17 = arith.constant 0 : index
    %c0_18 = arith.constant 0 : index
    %27 = vector.load %arg8[%c0_17, %c0_18] : memref<4x256xf32, #tpu.memory_space<vmem>>, vector<4x256xf32>
    tpu.vector_store %arg8[%c0_17, %c0_18], %26 {strides = array<i32>} : memref<4x256xf32, #tpu.memory_space<vmem>>, vector<4x256xf32>,
    return
  }
  func.func @transform_0(%arg0: i32) -> (i32, i32) {
    %c0_i32 = arith.constant 0 : i32
    %c0_i32_0 = arith.constant 0 : i32
    return %c0_i32, %arg0 : i32, i32
  }
  func.func @transform_1(%arg0: i32) -> (i32, i32) {
    %c0_i32 = arith.constant 0 : i32
    %c0_i32_0 = arith.constant 0 : i32
    %c0_i32_1 = arith.constant 0 : i32
    return %c0_i32, %c0_i32_0 : i32, i32
  }
  func.func @transform_2(%arg0: i32) -> (i32, i32) {
    %c0_i32 = arith.constant 0 : i32
    %c0_i32_0 = arith.constant 0 : i32
    %c0_i32_1 = arith.constant 0 : i32
    return %c0_i32, %c0_i32_0 : i32, i32
  }
  func.func @transform_3(%arg0: i32) -> (i32, i32) {
    %c0_i32 = arith.constant 0 : i32
    %c0_i32_0 = arith.constant 0 : i32
    %c0_i32_1 = arith.constant 0 : i32
    return %c0_i32, %c0_i32_0 : i32, i32
  }
  func.func @transform_4(%arg0: i32) -> (i32, i32) {
    %c0_i32 = arith.constant 0 : i32
    %c0_i32_0 = arith.constant 0 : i32
    %c0_i32_1 = arith.constant 0 : i32
    return %c0_i32, %c0_i32_0 : i32, i32
  }
  func.func @transform_5(%arg0: i32) -> (i32, i32) {
    %c0_i32 = arith.constant 0 : i32
    %c0_i32_0 = arith.constant 0 : i32
    %c0_i32_1 = arith.constant 0 : i32
    return %c0_i32, %c0_i32_0 : i32, i32
  }
  func.func @transform_6(%arg0: i32) -> (i32, i32) {
    %c0_i32 = arith.constant 0 : i32
    %c0_i32_0 = arith.constant 0 : i32
    %c0_i32_1 = arith.constant 0 : i32
    return %c0_i32, %c0_i32_0 : i32, i32
  }
  func.func @transform_7(%arg0: i32) -> (i32, i32) {
    %c0_i32 = arith.constant 0 : i32
    %c0_i32_0 = arith.constant 0 : i32
    return %c0_i32, %arg0 : i32, i32
  }
}

</mosaic_0001>

<bundles_post_ra>
// kernel: actor_forward.1
= control target key start
LH: loop header
LB: loop body
LE: loop exit
PB: predicated region body
PF: predicated region fallthrough
CT: control target
= control target key end

     0   :  { %12 = vsyncpa [#allocation3], 0  ;;  %vm85_vm0 = vcmask 64512   ;;  %v566_v2 = vmov 0   ;;  %vm236_vm1 = vcmask 523264   ;;  %vm322_vm2 = vcmask 261120   ;;  %s724_s0 = inlined_call_operand.vmem [shape: f32[8,6], index: 0, kind: input, shape index: {}]   ;;  %s725_s1 = inlined_call_operand.vmem [shape: f32[64,8], index: 1, kind: input, shape index: {}]   ;;  %s726_s2 = inlined_call_operand.vmem [shape: f32[64,1], index: 2, kind: input, shape index: {}]   ;;  %s727_s3 = inlined_call_operand.vmem [shape: f32[32,64], index: 3, kind: input, shape index: {}]   ;;  %s728_s4 = inlined_call_operand.vmem [shape: f32[32,1], index: 4, kind: input, shape index: {}]   ;;  %s729_s5 = inlined_call_operand.vmem [shape: f32[4,32], index: 5, kind: input, shape index: {}]   ;;  %s730_s6 = inlined_call_operand.vmem [shape: f32[4,1], index: 6, kind: input, shape index: {}]   ;;  %s731_s7 = inlined_call_operand.hbm [shape: f32[4,6], index: 7, kind: output, shape index: {}]  }
   0x1   :  { %v27_v0 = vld [vmem:[%s724_s0] sm:$0xff]  ;;  %v28_v1 = vld [vmem:[%s724_s0 + $0x8] sm:$0xff]  ;;  %482 = vset.pattern.permute.xlu1 %v566_v2  ;;  %v44_v5 = vld [vmem:[%s726_s2 + $0x38] sm:$0xff]  ;;  %481 = vset.pattern.permute.xlu0 %v566_v2  ;;  %vm366_vm3 = vcmask 1043456  }
   0x2   :  { %125 = vmatpush.msra.mxu0 %v27_v0  ;;  %v42_v3 = vld [vmem:[%s726_s2 + $0x28] sm:$0xff]  ;;  %v29_v4 = vld [vmem:[%s725_s1] sm:$0xff]  ;;  %166 = vmatpush.msra.mxu1 %v28_v1  ;;  %v43_v8 = vld [vmem:[%s726_s2 + $0x30] sm:$0xff] }
   0x3   :  { %72 = vperm.xlu1 %482, %v42_v3   ;;  %453 = vmatmul.msk.f32.vlgmr.msra.gmra.mxu0 %vm85_vm0, %v29_v4  ;;  %v41_v6 = vld [vmem:[%s726_s2 + $0x20] sm:$0xff]  ;;  %v30_v7 = vld [vmem:[%s725_s1 + $0x8] sm:$0xff]  ;;  %v40_v9 = vld [vmem:[%s726_s2 + $0x18] sm:$0xff] }
   0x4   :  { %461 = vmatmul.msk.f32.vlgmr.msra.gmra.mxu1 %vm85_vm0, %v29_v4  ;;  %483 = vset.pattern.permute.xlu2 %v566_v2  ;;  %v37_v10 = vld [vmem:[%s726_s2] sm:$0xff]  ;;  %v31_v11 = vld [vmem:[%s725_s1 + $0x10] sm:$0xff]  ;;  %v38_v12 = vld [vmem:[%s726_s2 + $0x8] sm:$0xff] }
   0x5   :  { %82 = vperm.xlu0 %481, %v44_v5   ;;  %62 = vperm.xlu2 %483, %v40_v9   ;;  %v39_v13 = vld [vmem:[%s726_s2 + $0x10] sm:$0xff]  ;;  %v32_v14 = vld [vmem:[%s725_s1 + $0x18] sm:$0xff]  ;;  %v213_v16 = vld [vmem:[%s728_s4 + $0x8] sm:$0xff] }
   0x6   :  { %v214_v15 = vld [vmem:[%s728_s4 + $0x10] sm:$0xff]  ;;  %v215_v17 = vld [vmem:[%s728_s4 + $0x18] sm:$0xff]  ;;  %v33_v18 = vld [vmem:[%s725_s1 + $0x20] sm:$0xff] }
   0x7   :  { %v212_v19 = vld [vmem:[%s728_s4] sm:$0xff]  ;;  %v34_v21 = vld [vmem:[%s725_s1 + $0x28] sm:$0xff]  ;;  %v35_v22 = vld [vmem:[%s725_s1 + $0x30] sm:$0xff] }
   0x8   :  { %v316_v20 = vld [vmem:[%s730_s6] sm:$0xf]  ;;  %v36_v23 = vld [vmem:[%s725_s1 + $0x38] sm:$0xff] }
   0xb   :  { %67 = vperm.xlu1 %482, %v41_v6   ;;  %454 = vmatmul.msk.f32.gmra.mxu0 %vm85_vm0, %v30_v7 }
   0xc   :  { %462 = vmatmul.msk.f32.gmra.mxu1 %vm85_vm0, %v30_v7 }
   0xd   :  { %77 = vperm.xlu0 %481, %v43_v8   ;;  %57 = vperm.xlu2 %483, %v39_v13  }
  0x13   :  { %47 = vperm.xlu1 %482, %v37_v10   ;;  %455 = vmatmul.msk.f32.gmra.mxu0 %vm85_vm0, %v31_v11 }
  0x14   :  { %463 = vmatmul.msk.f32.gmra.mxu1 %vm85_vm0, %v31_v11 }
  0x15   :  { %52 = vperm.xlu0 %481, %v38_v12   ;;  %233 = vperm.xlu2 %483, %v215_v17   ;;  %v209_v17 = vld [vmem:[%s727_s3 + $0x8] sm:$0xff] }
  0x1b   :  { %456 = vmatmul.msk.f32.gmra.mxu0 %vm85_vm0, %v32_v14  ;;  %223 = vperm.xlu1 %482, %v213_v16  }
  0x1c   :  { %464 = vmatmul.msk.f32.gmra.mxu1 %vm85_vm0, %v32_v14  ;;  %v208_v14 = vld [vmem:[%s727_s3] sm:$0xff] }
  0x1d   :  { %228 = vperm.xlu0 %481, %v214_v15   ;;  %218 = vperm.xlu2 %483, %v212_v19   ;;  %v211_v19 = vld [vmem:[%s727_s3 + $0x18] sm:$0xff] }
  0x23   :  { %457 = vmatmul.msk.f32.gmra.mxu0 %vm85_vm0, %v33_v18 }
  0x24   :  { %465 = vmatmul.msk.f32.gmra.mxu1 %vm85_vm0, %v33_v18  ;;  %v210_v18 = vld [vmem:[%s727_s3 + $0x10] sm:$0xff] }
  0x25   :  { %319 = vperm.xlu0 %481, %v316_v20  }
  0x2b   :  { %458 = vmatmul.msk.f32.gmra.mxu0 %vm85_vm0, %v34_v21 }
  0x2c   :  { %466 = vmatmul.msk.f32.gmra.mxu1 %vm85_vm0, %v34_v21 }
  0x33   :  { %459 = vmatmul.msk.f32.gmra.mxu0 %vm85_vm0, %v35_v22 }
  0x34   :  { %467 = vmatmul.msk.f32.gmra.mxu1 %vm85_vm0, %v35_v22 }
  0x3b   :  { %460 = vmatmul.msk.f32.gmra.mxu0 %vm85_vm0, %v36_v23 }
  0x3c   :  { %468 = vmatmul.msk.f32.gmra.mxu1 %vm85_vm0, %v36_v23 }
  0x5f   :  { %v63_v40 = vpop.permute.xlu2 %62 }
  0x67   :  { %v58_v53 = vpop.permute.xlu2 %57 }
  0x75   :  { %v73_v36 = vpop.permute.xlu1 %72 }
  0x77   :  { %v83_v37 = vpop.permute.xlu0 %82 }
  0x7d   :  { %v68_v41 = vpop.permute.xlu1 %67 }
  0x7f   :  { %v78_v42 = vpop.permute.xlu0 %77 }
  0x80   :  { %v127_v24 = vpop.f32.mrf.mxu0 }
  0x81   :  { %v168_v25 = vpop.f32.mrf.mxu1 }
  0x85   :  { %v48_v60 = vpop.permute.xlu1 %47 }
  0x86   :  { %v128_v3 = vadd.f32 %v127_v24, %v48_v60  ;;  %v169_v5 = vadd.f32 %v168_v25, %v48_v60 }
  0x87   :  { %v53_v57 = vpop.permute.xlu0 %52 }
  0x88   :  { %v130_v26 = vpop.f32.mrf.mxu0 }
  0x89   :  { %v171_v27 = vpop.f32.mrf.mxu1  ;;  %v131_v63 = vadd.f32 %v130_v26, %v53_v57  ;;  %v234_v26 = vpop.permute.xlu2 %233 }
  0x8a   :  { %v172_v1 = vadd.f32 %v171_v27, %v53_v57 }
  0x8f   :  { %v229_v27 = vpop.permute.xlu0 %228 }
  0x90   :  { %v133_v28 = vpop.f32.mrf.mxu0 }
  0x91   :  { %v174_v29 = vpop.f32.mrf.mxu1  ;;  %v134_v58 = vadd.f32 %v133_v28, %v58_v53 }
  0x92   :  { %v175_v61 = vadd.f32 %v174_v29, %v58_v53 }
  0x98   :  { %v136_v30 = vpop.f32.mrf.mxu0 }
  0x99   :  { %v177_v31 = vpop.f32.mrf.mxu1  ;;  %v137_v54 = vadd.f32 %v136_v30, %v63_v40 }
  0x9a   :  { %v178_v55 = vadd.f32 %v177_v31, %v63_v40 }
  0xa0   :  { %v139_v32 = vpop.f32.mrf.mxu0 }
  0xa1   :  { %v180_v33 = vpop.f32.mrf.mxu1  ;;  %v140_v51 = vadd.f32 %v139_v32, %v68_v41  ;;  %v224_v32 = vpop.permute.xlu1 %223 }
  0xa2   :  { %v181_v52 = vadd.f32 %v180_v33, %v68_v41 }
  0xa8   :  { %v142_v34 = vpop.f32.mrf.mxu0 }
  0xa9   :  { %v183_v35 = vpop.f32.mrf.mxu1  ;;  %v143_v49 = vadd.f32 %v142_v34, %v73_v36 }
  0xaa   :  { %v184_v50 = vadd.f32 %v183_v35, %v73_v36  ;;  %v219_v36 = vpop.permute.xlu2 %218 }
  0xb0   :  { %v145_v38 = vpop.f32.mrf.mxu0 }
  0xb1   :  { %v186_v39 = vpop.f32.mrf.mxu1  ;;  %v146_v45 = vadd.f32 %v145_v38, %v78_v42 }
  0xb2   :  { %v187_v48 = vadd.f32 %v186_v39, %v78_v42 }
  0xb8   :  { %v148_v43 = vpop.f32.mrf.mxu0 }
  0xb9   :  { %v189_v44 = vpop.f32.mrf.mxu1  ;;  %v149_v46 = vadd.f32 %v148_v43, %v83_v37 }
  0xba   :  { %v190_v47 = vadd.f32 %v189_v44, %v83_v37 }
  0xbb   :  { %484 = vtanh.f32 %v149_v46  ;;  %v315_v46 = vld [vmem:[%s729_s5] sm:$0xf] }
  0xbc   :  { %486 = vtanh.f32 %v190_v47 }
  0xbd   :  { %488 = vtanh.f32 %v146_v45 }
  0xbe   :  { %490 = vtanh.f32 %v187_v48 }
  0xbf   :  { %492 = vtanh.f32 %v143_v49  ;;  %v320_v49 = vpop.permute.xlu0 %319 }
  0xc0   :  { %494 = vtanh.f32 %v184_v50 }
  0xc1   :  { %v485_v56 = vpop.eup %484  ;;  %496 = vtanh.f32 %v140_v51 }
  0xc2   :  { %v487_v59 = vpop.eup %486  ;;  %498 = vtanh.f32 %v181_v52  ;;  %257 = vmatpush.msra.mxu2 %v485_v56 }
  0xc3   :  { %v489_v62 = vpop.eup %488  ;;  %500 = vtanh.f32 %v137_v54  ;;  %286 = vmatpush.msra.mxu3 %v487_v59 }
  0xc4   :  { %v491_v0 = vpop.eup %490  ;;  %502 = vtanh.f32 %v178_v55  ;;  %258 = vmatpush.msra.mxu2 %v489_v62 }
  0xc5   :  { %v493_v2 = vpop.eup %492  ;;  %504 = vtanh.f32 %v134_v58  ;;  %287 = vmatpush.msra.mxu3 %v491_v0 }
  0xc6   :  { %v495_v4 = vpop.eup %494  ;;  %506 = vtanh.f32 %v175_v61  ;;  %259 = vmatpush.msra.mxu2 %v493_v2 }
  0xc7   :  { %v497_v6 = vpop.eup %496  ;;  %508 = vtanh.f32 %v131_v63  ;;  %288 = vmatpush.msra.mxu3 %v495_v4 }
  0xc8   :  { %v499_v7 = vpop.eup %498  ;;  %510 = vtanh.f32 %v172_v1  ;;  %260 = vmatpush.msra.mxu2 %v497_v6 }
  0xc9   :  { %v501_v8 = vpop.eup %500  ;;  %512 = vtanh.f32 %v128_v3  ;;  %289 = vmatpush.msra.mxu3 %v499_v7 }
  0xca   :  { %v503_v9 = vpop.eup %502  ;;  %514 = vtanh.f32 %v169_v5  ;;  %261 = vmatpush.msra.mxu2 %v501_v8 }
  0xcb   :  { %v505_v10 = vpop.eup %504  ;;  %290 = vmatpush.msra.mxu3 %v503_v9 }
  0xcc   :  { %v507_v11 = vpop.eup %506  ;;  %262 = vmatpush.msra.mxu2 %v505_v10 }
  0xcd   :  { %v509_v12 = vpop.eup %508  ;;  %291 = vmatpush.msra.mxu3 %v507_v11 }
  0xce   :  { %v511_v13 = vpop.eup %510  ;;  %263 = vmatpush.msra.mxu2 %v509_v12 }
  0xcf   :  { %v513_v15 = vpop.eup %512  ;;  %292 = vmatpush.msra.mxu3 %v511_v13 }
  0xd0   :  { %v515_v16 = vpop.eup %514  ;;  %264 = vmatpush.msra.mxu2 %v513_v15 }
  0xd1   :  { %293 = vmatpush.msra.mxu3 %v515_v16  ;;  %469 = vmatmul.msk.f32.vlgmr.msra.gmra.mxu2 %vm236_vm1, %v208_v14 }
  0xd2   :  { %473 = vmatmul.msk.f32.vlgmr.msra.gmra.mxu3 %vm236_vm1, %v208_v14 }
  0xd9   :  { %470 = vmatmul.msk.f32.gmra.mxu2 %vm236_vm1, %v209_v17 }
  0xda   :  { %474 = vmatmul.msk.f32.gmra.mxu3 %vm236_vm1, %v209_v17 }
  0xe1   :  { %471 = vmatmul.msk.f32.gmra.mxu2 %vm236_vm1, %v210_v18 }
  0xe2   :  { %475 = vmatmul.msk.f32.gmra.mxu3 %vm236_vm1, %v210_v18 }
  0xe9   :  { %472 = vmatmul.msk.f32.gmra.mxu2 %vm236_vm1, %v211_v19 }
  0xea   :  { %476 = vmatmul.msk.f32.gmra.mxu3 %vm236_vm1, %v211_v19 }
 0x154   :  { %v266_v20 = vpop.f32.mrf.mxu2 }
 0x155   :  { %v295_v21 = vpop.f32.mrf.mxu3  ;;  %v267_v38 = vadd.f32 %v266_v20, %v219_v36 }
 0x156   :  { %v296_v39 = vadd.f32 %v295_v21, %v219_v36 }
 0x15c   :  { %v269_v22 = vpop.f32.mrf.mxu2 }
 0x15d   :  { %v298_v23 = vpop.f32.mrf.mxu3  ;;  %v270_v35 = vadd.f32 %v269_v22, %v224_v32 }
 0x15e   :  { %v299_v37 = vadd.f32 %v298_v23, %v224_v32 }
 0x164   :  { %v272_v24 = vpop.f32.mrf.mxu2 }
 0x165   :  { %v301_v25 = vpop.f32.mrf.mxu3  ;;  %v273_v29 = vadd.f32 %v272_v24, %v229_v27 }
 0x166   :  { %v302_v33 = vadd.f32 %v301_v25, %v229_v27 }
 0x16c   :  { %v275_v28 = vpop.f32.mrf.mxu2 }
 0x16d   :  { %v276_v30 = vadd.f32 %v275_v28, %v234_v26  ;;  %v304_v31 = vpop.f32.mrf.mxu3 }
 0x16e   :  { %v305_v34 = vadd.f32 %v304_v31, %v234_v26 }
 0x16f   :  { %516 = vtanh.f32 %v276_v30 }
 0x170   :  { %518 = vtanh.f32 %v305_v34 }
 0x171   :  { %520 = vtanh.f32 %v273_v29 }
 0x172   :  { %522 = vtanh.f32 %v302_v33 }
 0x173   :  { %524 = vtanh.f32 %v270_v35 }
 0x174   :  { %526 = vtanh.f32 %v299_v37 }
 0x175   :  { %v517_v40 = vpop.eup %516  ;;  %528 = vtanh.f32 %v267_v38 }
 0x176   :  { %v519_v41 = vpop.eup %518  ;;  %530 = vtanh.f32 %v296_v39  ;;  %338 = vmatpush.msrb.mxu2 %v517_v40 }
 0x177   :  { %v521_v42 = vpop.eup %520  ;;  %358 = vmatpush.msrb.mxu3 %v519_v41 }
 0x178   :  { %v523_v43 = vpop.eup %522  ;;  %339 = vmatpush.msrb.mxu2 %v521_v42 }
 0x179   :  { %v525_v44 = vpop.eup %524  ;;  %359 = vmatpush.msrb.mxu3 %v523_v43 }
 0x17a   :  { %v527_v45 = vpop.eup %526  ;;  %340 = vmatpush.msrb.mxu2 %v525_v44 }
 0x17b   :  { %v529_v47 = vpop.eup %528  ;;  %360 = vmatpush.msrb.mxu3 %v527_v45 }
 0x17c   :  { %v531_v48 = vpop.eup %530  ;;  %341 = vmatpush.msrb.mxu2 %v529_v47 }
 0x17d   :  { %361 = vmatpush.msrb.mxu3 %v531_v48  ;;  %477 = vmatmul.msk.f32.vlgmr.msrb.gmra.mxu2 %vm322_vm2, %v315_v46 }
 0x17e   :  { %478 = vmatmul.msk.f32.vlgmr.msrb.gmra.mxu3 %vm322_vm2, %v315_v46 }
 0x200   :  { %v343_v50 = vpop.f32.mrf.mxu2 }
 0x201   :  { %v344_v51 = vadd.f32 %v343_v50, %v320_v49  ;;  %v363_v52 = vpop.f32.mrf.mxu3 }
 0x202   :  { %v364_v53 = vadd.f32 %v363_v52, %v320_v49 }
 0x203   :  { %v367_v54 = vsel %vm366_vm3, %v344_v51, -inf }
 0x204   :  { %v368_v55 = vrot.slane %v367_v54, 4  ;;  %v374_v56 = vsel %vm366_vm3, %v364_v53, -inf }
 0x205   :  { %v375_v57 = vrot.slane %v374_v56, 4 }
 0x206   :  { %v369_v58 = vmax.f32 %v367_v54, %v368_v55 }
 0x207   :  { %v376_v59 = vmax.f32 %v374_v56, %v375_v57 }
 0x208   :  { %v370_v60 = vrot.slane %v369_v58, 2 }
 0x209   :  { %v377_v61 = vrot.slane %v376_v59, 2 }
 0x20a   :  { %v371_v62 = vmax.f32 %v369_v58, %v370_v60 }
 0x20b   :  { %v378_v63 = vmax.f32 %v376_v59, %v377_v61 }
 0x20c   :  { %v372_v0 = vrot.slane %v371_v62, 1 }
 0x20d   :  { %v379_v1 = vrot.slane %v378_v63, 1 }
 0x20e   :  { %v373_v2 = vmax.f32 %v371_v62, %v372_v0 }
 0x20f   :  { %v380_v3 = vmax.f32 %v378_v63, %v379_v1 }
 0x210   :  { %v381_v4 = vsub.f32 %v344_v51, %v373_v2 }
 0x211   :  { %v382_v5 = vsub.f32 %v364_v53, %v380_v3 }
 0x212   :  { %v383_v6 = vmul.f32 1.442695, %v381_v4 }
 0x213   :  { %v385_v7 = vmul.f32 1.442695, %v382_v5 }
 0x214   :  { %532 = vpow2.f32 %v383_v6 }
 0x215   :  { %534 = vpow2.f32 %v385_v7 }
 0x21a   :  { %v533_v8 = vpop.eup %532 }
 0x21b   :  { %v535_v9 = vpop.eup %534  ;;  %v387_v10 = vsel %vm366_vm3, %v533_v8, 0.0 }
 0x21c   :  { %v388_v11 = vrot.slane %v387_v10, 4  ;;  %v394_v12 = vsel %vm366_vm3, %v535_v9, 0.0 }
 0x21d   :  { %v395_v13 = vrot.slane %v394_v12, 4 }
 0x21e   :  { %v389_v14 = vadd.f32 %v388_v11, %v387_v10 }
 0x21f   :  { %v396_v15 = vadd.f32 %v395_v13, %v394_v12 }
 0x220   :  { %v390_v16 = vrot.slane %v389_v14, 2 }
 0x221   :  { %v397_v17 = vrot.slane %v396_v15, 2 }
 0x222   :  { %v391_v18 = vadd.f32 %v390_v16, %v389_v14 }
 0x223   :  { %v398_v19 = vadd.f32 %v397_v17, %v396_v15 }
 0x224   :  { %v392_v20 = vrot.slane %v391_v18, 1 }
 0x225   :  { %v399_v21 = vrot.slane %v398_v19, 1 }
 0x226   :  { %v393_v22 = vadd.f32 %v392_v20, %v391_v18 }
 0x227   :  { %v400_v23 = vadd.f32 %v399_v21, %v398_v19 }
 0x228   :  { %536 = vrcp.f32 %v393_v22  ;;  %v412_v31 = vand.u32 2147483648, %v393_v22  ;;  %v410_v33 = vand.u32 2147483647, %v393_v22  ;;  %vm406_vm6 = vweird.f32 %v393_v22 }
 0x229   :  { %538 = vrcp.f32 %v400_v23  ;;  %v427_v32 = vand.u32 2147483648, %v400_v23  ;;  %v425_v35 = vand.u32 2147483647, %v400_v23  ;;  %vm421_vm8 = vweird.f32 %v400_v23 }
 0x22a   :  { %v413_v39 = vor.u32 1.1754944e-38, %v412_v31  ;;  %vm411_vm10 = vcmp.eq.f32.partialorder %v410_v33, 8.507059e+37 }
 0x22b   :  { %v428_v40 = vor.u32 1.1754944e-38, %v427_v32  ;;  %vm426_vm11 = vcmp.eq.f32.partialorder %v425_v35, 8.507059e+37 }
 0x22e   :  { %v537_v24 = vpop.eup %536 }
 0x22f   :  { %v539_v25 = vpop.eup %538  ;;  %v402_v26 = vmul.f32 %v537_v24, %v393_v22  ;;  %vm407_vm4 = vweird.f32 %v537_v24 }
 0x230   :  { %v417_v27 = vmul.f32 %v539_v25, %v400_v23  ;;  %vm422_vm5 = vweird.f32 %v539_v25  ;;  %vm408_vm7 = vmor %vm406_vm6, %vm407_vm4 }
 0x231   :  { %v403_v28 = vsub.f32 1.0, %v402_v26  ;;  %vm423_vm9 = vmor %vm421_vm8, %vm422_vm5 }
 0x232   :  { %v418_v29 = vsub.f32 1.0, %v417_v27 }
 0x233   :  { %v404_v30 = vmul.f32 %v537_v24, %v403_v28 }
 0x234   :  { %v419_v34 = vmul.f32 %v539_v25, %v418_v29 }
 0x235   :  { %v405_v36 = vadd.f32 %v537_v24, %v404_v30 }
 0x236   :  { %v420_v37 = vadd.f32 %v539_v25, %v419_v34 }
 0x237   :  { %v409_v38 = vsel %vm408_vm7, %v537_v24, %v405_v36 }
 0x238   :  { %v424_v41 = vsel %vm423_vm9, %v539_v25, %v420_v37  ;;  %v414_v42 = vsel %vm411_vm10, %v413_v39, %v409_v38 }
 0x239   :  { %v429_v43 = vsel %vm426_vm11, %v428_v40, %v424_v41  ;;  %v415_v45 = vmul.f32 %v533_v8, %v414_v42 }
 0x23a   :  { %v430_v44 = vmul.f32 %v535_v9, %v429_v43 }
 0x23c   :  { %v433_v46 = vrot.slane %v430_v44, 4 }
 0x23e   :  { %v434_v47 = vsel %vm366_vm3, %v415_v45, %v433_v46 }
 0x23f   :  { %436 = vst [vmem:[#allocation2] sm:$0xff] %v434_v47 }
 0x240   :  { %440 = vsyncadd [#allocation3], 64  ;;  %s444_s28 = sshll.u32 %s731_s7, 4  ;;  %s567_s29 = smov [#allocation2]   ;;  %s445_s28 = int_to_ptr.hbm [resolvable:$true] %s444_s28 }
 0x241   :  { %s442_s30 = sshll.u32 %s567_s29, 4  ;;  %s443_s30 = int_to_ptr.vmem [resolvable:$true] %s442_s30 }
 0x242   :  { %447 = dma.vmem_to_hbm [thread:$0]  %s443_s30, 64, %s445_s28, [#allocation3]  }
 0x243   :  { %564 = dma.done.wait [#allocation3], 128  }
 0x244   :  { %565 = vsyncadd [#allocation3], 4294967168 }
 0x245   :  { %452 = vsyncpa [#allocation3], 1 }

</bundles_post_ra>
